<compile_context>
chip_gen: v6e
topology: v6e:2x2x1
jax: 0.10.0
libtpu: 0.0.40
codegen_flags: <defaults>
</compile_context>

<pallas_src>
import functools
import math

import jax
import jax.numpy as jnp
from jax.experimental import pallas as pl
from jax.experimental.pallas import tpu as pltpu


def _round_up(x, m):
    return ((x + m - 1) // m) * m


def _make_discriminator_kernel(n_hidden_layers, n_in_pad, n_skills):
    """kernel(x_tile, W_stack, b_stack) -> logits_tile ([bt, n_skills])."""

    def kernel(x_ref, w_ref, b_ref, o_ref):
        w_dtype = w_ref.dtype
        # Layer 0: real (16-padded) input width against a static sublane slice
        # of the resident weight stack -- no 128-lane activation stream.
        h = jnp.dot(
            x_ref[...], w_ref[0, :n_in_pad, :], preferred_element_type=jnp.float32
        )
        h = jnp.maximum(h + b_ref[0], 0.0)  # bias/ReLU in f32 (v5e-safe)
        # Remaining hidden layers (statically unrolled).
        for l in range(1, n_hidden_layers):
            h = jnp.dot(
                h.astype(w_dtype), w_ref[l], preferred_element_type=jnp.float32
            )
            h = jnp.maximum(h + b_ref[l], 0.0)
        # Classifier head (no ReLU): only the first n_skills lanes are real;
        # store just those (masked vst on a tiny slab beats 128-lane writeback).
        logits = (
            jnp.dot(
                h.astype(w_dtype),
                w_ref[n_hidden_layers],
                preferred_element_type=jnp.float32,
            )
            + b_ref[n_hidden_layers]
        )
        o_ref[...] = logits[:, :n_skills]

    return kernel


def init_discriminator_params(key, n_input, n_hiddens, n_skills, dtype=jnp.float32):
    """Uniform init with PyTorch-Linear-like 1/sqrt(fan_in) bounds.

    Returns a list of (W, b) with W stored as [in_features, out_features]
    (so the kernel computes x @ W + b, equivalent to torch's x @ W.T + b).
    """
    dims = [n_input] + list(n_hiddens) + [n_skills]
    keys = jax.random.split(key, len(dims) - 1)
    params = []
    for i in range(len(dims) - 1):
        bound = 1.0 / math.sqrt(dims[i])
        kw, kb = jax.random.split(keys[i])
        w = jax.random.uniform(kw, (dims[i], dims[i + 1]), dtype, -bound, bound)
        b = jax.random.uniform(kb, (dims[i + 1],), dtype, -bound, bound)
        params.append((w, b))
    return params


def pack_discriminator_params(params, weight_dtype=jnp.bfloat16):
    """Zero-pad every layer to a common 128-aligned width and stack.

    Returns (w_stack [L, D_pad, D_pad] in `weight_dtype`, b_stack [L, 1, D_pad]
    in f32).  Zero padding is exact: padded input columns are zero, padded
    weight rows/cols are zero, padded bias entries are zero, so padded
    activation lanes stay exactly zero through every layer (ReLU(0) = 0).
    """
    d_pad = _round_up(max(max(w.shape) for w, _ in params), 128)
    n_layers = len(params)
    w_stack = jnp.zeros((n_layers, d_pad, d_pad), weight_dtype)
    b_stack = jnp.zeros((n_layers, 1, d_pad), jnp.float32)
    for l, (w, b) in enumerate(params):
        w_stack = w_stack.at[l, : w.shape[0], : w.shape[1]].set(w.astype(weight_dtype))
        b_stack = b_stack.at[l, 0, : b.shape[0]].set(b.astype(jnp.float32))
    return w_stack, b_stack


@functools.partial(jax.jit, static_argnames=("n_input", "n_skills", "batch_tile"))
def discriminator_forward(x, w_stack, b_stack, *, n_input, n_skills, batch_tile=2048):
    """Fused Discriminator forward: returns f32 logits of shape [batch, n_skills]."""
    batch = x.shape[0]
    n_layers_total, d_pad, _ = w_stack.shape
    n_hidden_layers = n_layers_total - 1
    n_in_pad = _round_up(n_input, 16)  # sublane-aligned for bf16 weight slice
    io_dtype = w_stack.dtype

    # Resident-weights path is only valid while the stack comfortably fits
    # VMEM (v7x scoped default is 32 MiB of its 64 MiB).
    resident_bytes = (
        w_stack.size * w_stack.dtype.itemsize + b_stack.size * b_stack.dtype.itemsize
    )
    if resident_bytes > 8 * 1024 * 1024:
        # TODO(synk): for large hidden widths, add a layer grid axis
        # ("arbitrary") or pltpu.emit_pipeline to stream weights instead.
        raise NotImplementedError("weight stack too large for resident-VMEM path")

    # Batch tile: multiple of 16 (bf16 sublane packing), big by default --
    # the per-step working set is ~1-2 MiB so VMEM is not the constraint.
    bt = _round_up(min(batch_tile, max(batch, 1)), 16)
    # Keep >= 2 grid steps when the batch is big enough so v7x's second
    # TensorCore gets work via dimension_semantics=("parallel",).
    if batch >= 32:
        bt = min(bt, _round_up((batch + 1) // 2, 16))
    batch_pad = _round_up(batch, bt)

    # Pad only the batch dim (and n_input -> n_in_pad); no 128-lane slab.
    if batch_pad == batch and n_in_pad == n_input and x.dtype == io_dtype:
        x_in = x
    else:
        x_in = jnp.zeros((batch_pad, n_in_pad), io_dtype)
        x_in = x_in.at[:batch, :n_input].set(x.astype(io_dtype))

    kernel = _make_discriminator_kernel(n_hidden_layers, n_in_pad, n_skills)

    flops = 2 * batch_pad * d_pad * (n_in_pad + n_hidden_layers * d_pad)
    bytes_accessed = (
        x_in.size * x_in.dtype.itemsize
        + resident_bytes
        + batch_pad * n_skills * 4
    )

    out = pl.pallas_call(
        kernel,
        out_shape=jax.ShapeDtypeStruct((batch_pad, n_skills), jnp.float32),
        grid_spec=pltpu.PrefetchScalarGridSpec(
            num_scalar_prefetch=0,
            grid=(batch_pad // bt,),
            in_specs=[
                # Activation tile: streamed / double-buffered over the batch
                # grid at its real feature width (last dim == full array dim).
                pl.BlockSpec((bt, n_in_pad), lambda i: (i, 0)),
                # Packed weights & biases: constant block -> VMEM-resident
                # across all grid steps (single DMA each).
                pl.BlockSpec((n_layers_total, d_pad, d_pad), lambda i: (0, 0, 0)),
                pl.BlockSpec((n_layers_total, 1, d_pad), lambda i: (0, 0, 0)),
            ],
            # Narrow (n_skills-wide) output block: writes only the used lanes.
            out_specs=pl.BlockSpec((bt, n_skills), lambda i: (i, 0)),
        ),
        compiler_params=pltpu.CompilerParams(
            dimension_semantics=("parallel",),
        ),
        cost_estimate=pl.CostEstimate(
            flops=flops, transcendentals=0, bytes_accessed=bytes_accessed
        ),
    )(x_in, w_stack, b_stack)

    return out[:batch] if batch_pad != batch else out


def _reference_forward(x, params):
    h = x.astype(jnp.float32)
    for w, b in params[:-1]:
        h = jnp.maximum(h @ w + b, 0.0)
    w, b = params[-1]
    return h @ w + b


def _bf16_quantized_params(params):
    # The kernel keeps weights and the input stream in bf16; comparing against
    # a reference built from identically-rounded weights isolates kernel
    # correctness from the expected bf16 quantization noise.
    return [
        (w.astype(jnp.bfloat16).astype(jnp.float32), b.astype(jnp.float32))
        for w, b in params
    ]


if __name__ == "__main__":
    # Small shapes consistent with the module: n_input=16, hiddens=[32, 32],
    # n_skills=4.
    n_input, n_hiddens, n_skills = 16, [32, 32], 4

    key = jax.random.PRNGKey(0)
    key_x, key_x2, key_p = jax.random.split(key, 3)

    params = init_discriminator_params(key_p, n_input, n_hiddens, n_skills)
    w_stack, b_stack = pack_discriminator_params(params)
    q_params = _bf16_quantized_params(params)

    # --- Check 1: tiny batch (single grid step) ------------------------------
    x = jax.random.normal(key_x, (8, n_input), dtype=jnp.float32)
    logits = discriminator_forward(
        x, w_stack, b_stack, n_input=n_input, n_skills=n_skills)
    jax.block_until_ready(logits)
    ref = _reference_forward(x.astype(jnp.bfloat16).astype(jnp.float32), q_params)
    assert logits.shape == (8, n_skills)
    assert jnp.allclose(logits, ref, atol=3e-2, rtol=3e-2), float(
        jnp.max(jnp.abs(logits - ref)))

    # --- Check 2: un-aligned batch exercising the gridded / padded path ------
    x2 = jax.random.normal(key_x2, (200, n_input), dtype=jnp.float32)
    logits2 = discriminator_forward(
        x2, w_stack, b_stack, n_input=n_input, n_skills=n_skills, batch_tile=64)
    jax.block_until_ready(logits2)
    ref2 = _reference_forward(x2.astype(jnp.bfloat16).astype(jnp.float32), q_params)
    assert logits2.shape == (200, n_skills)
    assert jnp.allclose(logits2, ref2, atol=3e-2, rtol=3e-2), float(
        jnp.max(jnp.abs(logits2 - ref2)))

    print("KERNEL_OK")
</pallas_src>

<mosaic_0001>
module attributes {stable_mosaic.version = 11 : i64} {
  func.func @kernel(%arg0: i32, %arg1: memref<16x16xbf16, #tpu.memory_space<vmem>>, %arg2: memref<3x128x128xbf16, #tpu.memory_space<vmem>>, %arg3: memref<3x1x128xf32, #tpu.memory_space<vmem>>, %arg4: memref<16x4xf32, #tpu.memory_space<vmem>>) attributes {dimension_semantics = [#tpu.dimension_semantics<parallel>], iteration_bounds = array<i64: 1>, scalar_prefetch = 0 : i64, scratch_operands = 0 : i64, tpu.core_type = #tpu.core_type<tc>, window_params = [{transform_indices = @transform_0, window_bounds = array<i64: 16, 16>}, {pipeline_mode = #tpu.pipeline_mode<synchronous>, transform_indices = @transform_1, window_bounds = array<i64: 3, 128, 128>}, {pipeline_mode = #tpu.pipeline_mode<synchronous>, transform_indices = @transform_2, window_bounds = array<i64: 3, 1, 128>}, {transform_indices = @transform_3, window_bounds = array<i64: 16, 4>}]} {
    %c0 = arith.constant 0 : index
    %c0_0 = arith.constant 0 : index
    %0 = vector.load %arg1[%c0, %c0_0] : memref<16x16xbf16, #tpu.memory_space<vmem>>, vector<16x16xbf16>
    %c0_1 = arith.constant 0 : index
    %c0_2 = arith.constant 0 : index
    %c0_3 = arith.constant 0 : index
    %1 = vector.load %arg2[%c0_1, %c0_2, %c0_3] : memref<3x128x128xbf16, #tpu.memory_space<vmem>>, vector<1x16x128xbf16>
    %2 = vector.shape_cast %1 : vector<1x16x128xbf16> to vector<16x128xbf16>
    %cst = arith.constant dense<0.000000e+00> : vector<16x128xf32>
    %3 = tpu.matmul %0, %2, %cst {dimension_numbers = #tpu.dot_dimension_numbers<[1], [0], [0], [1], [0, 0, 1, 1], [], []>} : vector<16x16xbf16>, vector<16x128xbf16>, vector<16x128xf32> -> vector<16x128xf32>
    %c0_4 = arith.constant 0 : index
    %c0_5 = arith.constant 0 : index
    %c0_6 = arith.constant 0 : index
    %4 = vector.load %arg3[%c0_4, %c0_5, %c0_6] : memref<3x1x128xf32, #tpu.memory_space<vmem>>, vector<1x1x128xf32>
    %5 = vector.shape_cast %4 : vector<1x1x128xf32> to vector<1x128xf32>
    %6 = vector.broadcast %5 : vector<1x128xf32> to vector<16x128xf32>
    %7 = arith.addf %3, %6 : vector<16x128xf32>
    %cst_7 = arith.constant 0.000000e+00 : f32
    %8 = vector.broadcast %cst_7 : f32 to vector<16x128xf32>
    %9 = arith.maximumf %7, %8 : vector<16x128xf32>
    %10 = arith.truncf %9 : vector<16x128xf32> to vector<16x128xbf16>
    %c1 = arith.constant 1 : index
    %c0_8 = arith.constant 0 : index
    %c0_9 = arith.constant 0 : index
    %11 = vector.load %arg2[%c1, %c0_8, %c0_9] : memref<3x128x128xbf16, #tpu.memory_space<vmem>>, vector<1x128x128xbf16>
    %12 = vector.shape_cast %11 : vector<1x128x128xbf16> to vector<128x128xbf16>
    %cst_10 = arith.constant dense<0.000000e+00> : vector<16x128xf32>
    %13 = tpu.matmul %10, %12, %cst_10 {dimension_numbers = #tpu.dot_dimension_numbers<[1], [0], [0], [1], [0, 0, 1, 1], [], []>} : vector<16x128xbf16>, vector<128x128xbf16>, vector<16x128xf32> -> vector<16x128xf32>
    %c1_11 = arith.constant 1 : index
    %c0_12 = arith.constant 0 : index
    %c0_13 = arith.constant 0 : index
    %14 = vector.load %arg3[%c1_11, %c0_12, %c0_13] : memref<3x1x128xf32, #tpu.memory_space<vmem>>, vector<1x1x128xf32>
    %15 = vector.shape_cast %14 : vector<1x1x128xf32> to vector<1x128xf32>
    %16 = vector.broadcast %15 : vector<1x128xf32> to vector<16x128xf32>
    %17 = arith.addf %13, %16 : vector<16x128xf32>
    %cst_14 = arith.constant 0.000000e+00 : f32
    %18 = vector.broadcast %cst_14 : f32 to vector<16x128xf32>
    %19 = arith.maximumf %17, %18 : vector<16x128xf32>
    %20 = arith.truncf %19 : vector<16x128xf32> to vector<16x128xbf16>
    %c2 = arith.constant 2 : index
    %c0_15 = arith.constant 0 : index
    %c0_16 = arith.constant 0 : index
    %21 = vector.load %arg2[%c2, %c0_15, %c0_16] : memref<3x128x128xbf16, #tpu.memory_space<vmem>>, vector<1x128x128xbf16>
    %22 = vector.shape_cast %21 : vector<1x128x128xbf16> to vector<128x128xbf16>
    %cst_17 = arith.constant dense<0.000000e+00> : vector<16x128xf32>
    %23 = tpu.matmul %20, %22, %cst_17 {dimension_numbers = #tpu.dot_dimension_numbers<[1], [0], [0], [1], [0, 0, 1, 1], [], []>} : vector<16x128xbf16>, vector<128x128xbf16>, vector<16x128xf32> -> vector<16x128xf32>
    %c2_18 = arith.constant 2 : index
    %c0_19 = arith.constant 0 : index
    %c0_20 = arith.constant 0 : index
    %24 = vector.load %arg3[%c2_18, %c0_19, %c0_20] : memref<3x1x128xf32, #tpu.memory_space<vmem>>, vector<1x1x128xf32>
    %25 = vector.shape_cast %24 : vector<1x1x128xf32> to vector<1x128xf32>
    %26 = vector.broadcast %25 : vector<1x128xf32> to vector<16x128xf32>
    %27 = arith.addf %23, %26 : vector<16x128xf32>
    %28 = vector.extract_strided_slice %27 {offsets = [0, 0], sizes = [16, 4], strides = [1, 1]} : vector<16x128xf32> to vector<16x4xf32>
    %c0_21 = arith.constant 0 : index
    %c0_22 = arith.constant 0 : index
    %29 = vector.load %arg4[%c0_21, %c0_22] : memref<16x4xf32, #tpu.memory_space<vmem>>, vector<16x4xf32>
    tpu.vector_store %arg4[%c0_21, %c0_22], %28 {strides = array<i32>} : memref<16x4xf32, #tpu.memory_space<vmem>>, vector<16x4xf32>,
    return
  }
  func.func @transform_0(%arg0: i32) -> (i32, i32) {
    %c0_i32 = arith.constant 0 : i32
    %c0_i32_0 = arith.constant 0 : i32
    return %arg0, %c0_i32 : i32, i32
  }
  func.func @transform_1(%arg0: i32) -> (i32, i32, i32) {
    %c0_i32 = arith.constant 0 : i32
    %c0_i32_0 = arith.constant 0 : i32
    %c0_i32_1 = arith.constant 0 : i32
    %c0_i32_2 = arith.constant 0 : i32
    return %c0_i32, %c0_i32_0, %c0_i32_1 : i32, i32, i32
  }
  func.func @transform_2(%arg0: i32) -> (i32, i32, i32) {
    %c0_i32 = arith.constant 0 : i32
    %c0_i32_0 = arith.constant 0 : i32
    %c0_i32_1 = arith.constant 0 : i32
    %c0_i32_2 = arith.constant 0 : i32
    return %c0_i32, %c0_i32_0, %c0_i32_1 : i32, i32, i32
  }
  func.func @transform_3(%arg0: i32) -> (i32, i32) {
    %c0_i32 = arith.constant 0 : i32
    %c0_i32_0 = arith.constant 0 : i32
    return %arg0, %c0_i32 : i32, i32
  }
}

</mosaic_0001>

<bundles_post_ra>
// kernel: discriminator_forward.1
= control target key start
LH: loop header
LB: loop body
LE: loop exit
PB: predicated region body
PF: predicated region fallthrough
CT: control target
= control target key end

     0   :  { %8 = vsyncpa [#allocation3], 0  ;;  %s473_s12 = smov [#allocation2]   ;;  %s539_s0 = inlined_call_operand.vmem [shape: bf16[16,16], index: 0, kind: input, shape index: {}]   ;;  %s540_s1 = inlined_call_operand.hbm [shape: bf16[3,128,128], index: 1, kind: input, shape index: {}]   ;;  %s541_s2 = inlined_call_operand.vmem [shape: f32[3,1,128], index: 2, kind: input, shape index: {}]   ;;  %s542_s3 = inlined_call_operand.vmem [shape: f32[16,4], index: 3, kind: output, shape index: {}]  }
   0x1   :  { %s16_s13 = sshll.u32 %s473_s12, 4  ;;  %s17_s13 = int_to_ptr.vmem [resolvable:$true] %s16_s13 }
   0x2   :  { %s459_s14 = scalar_lea.vmem %s17_s13, 3072  ;;  %p464_p1 = scmp.lt.s32.totalorder %s17_s13, %s17_s13 }
   0x3   :  { %p460_p0 = scmp.ne.s32.totalorder %s17_s13, %s459_s14  ;;  %p465_p2 = scmp.lt.s32.totalorder %s459_s14, %s459_s14 }
   0x5   :  { %p466_p3 = por %p465_p2, %p464_p1 }
   0x7   :  { %p467_p4 = pnand %p466_p3, %p460_p0 }
   0x9   :  { %470 = shalt.err (!%p467_p4)
}
   0xa   :  { %s474_s15 = smov 64   ;;  %s475_s16 = smov 4  }
   0xb   :  { %22 = dma.hbm_to_vmem [thread:$0]  %s540_s1, 3072, %s17_s13, [#allocation3], %s474_s15, %s474_s15, %s475_s16  }
   0xc   :  { %471 = dma.done.wait [#allocation3], 3072  }
   0xd   :  { %472 = vsyncadd [#allocation3], 4294964224  ;;  %v476_v0 = vmov 0.0   ;;  %vm477_vm0 = vmmov 0   ;;  %v433_v1 = vld [vmem:[#allocation2] sm:$0xff]   ;;  %vm51_vm1 = vcmask 130048  }
   0xe   :  { %382 = vmatprep.subr.bf16.mxu0 %v476_v0  ;;  %384 = vmatprep.mubr.msk.bf16.mxu0 %vm477_vm0, %v476_v0  ;;  %v434_v2 = vld [vmem:[%s539_s0] sm:$0xff]   ;;  %v435_v3 = vld [vmem:[#allocation2 + $0x78] sm:$0xff]   ;;  %v436_v4 = vld [vmem:[#allocation2 + $0x70] sm:$0xff]   ;;  %vm330_vm2 = vcmask 31744  }
   0xf   :  { %388 = vmatprep.subr.bf16.mxu1 %v476_v0  ;;  %404 = vmatprep.mubr.msk.bf16.mxu1 %vm477_vm0, %v476_v0  ;;  %v437_v5 = vld [vmem:[#allocation2 + $0x68] sm:$0xff]   ;;  %v438_v6 = vld [vmem:[#allocation2 + $0x60] sm:$0xff]   ;;  %v439_v7 = vld [vmem:[#allocation2 + $0x58] sm:$0xff]  }
  0x10   :  { %383 = vmatpush3.bf16.msra.mxu0 %v433_v1  ;;  %389 = vmatpush3.bf16.msra.mxu1 %v435_v3  ;;  %v440_v8 = vld [vmem:[#allocation2 + $0x50] sm:$0xff]   ;;  %v441_v9 = vld [vmem:[#allocation2 + $0x48] sm:$0xff]   ;;  %v442_v10 = vld [vmem:[#allocation2 + $0x40] sm:$0xff]  }
  0x11   :  { %408 = vmatprep.subr.bf16.mxu0 %v476_v0  ;;  %390 = vmatprep.subr.bf16.mxu1 %v476_v0  ;;  %v443_v11 = vld [vmem:[#allocation2 + $0xb8] sm:$0xff]   ;;  %v444_v12 = vld [vmem:[#allocation2 + $0xb0] sm:$0xff]   ;;  %v445_v13 = vld [vmem:[#allocation2 + $0xa8] sm:$0xff]  }
  0x12   :  { %v446_v14 = vld [vmem:[#allocation2 + $0xa0] sm:$0xff]   ;;  %v447_v15 = vld [vmem:[#allocation2 + $0x98] sm:$0xff]   ;;  %v448_v26 = vld [vmem:[#allocation2 + $0x90] sm:$0xff]  }
  0x13   :  { %385 = vmatmul.mubr.msk.bf16.vlgmr.msra.gmra.mxu0 %vm51_vm1, %v434_v2  ;;  %v338_v16 = vld [vmem:[%s541_s2] ss:$0 sm:$0xff]  ;;  %v449_v27 = vld [vmem:[#allocation2 + $0x88] sm:$0xff]   ;;  %v343_v29 = vld [vmem:[%s541_s2 + $0x1] ss:$0 sm:$0xff] }
  0x14   :  { %424 = vmatprep.mubr.msk.bf16.mxu0 %vm477_vm0, %v476_v0  ;;  %391 = vmatpush3.bf16.msra.mxu1 %v436_v4  ;;  %v450_v28 = vld [vmem:[#allocation2 + $0x80] sm:$0xff]  }
  0x15   :  { %392 = vmatprep.subr.bf16.mxu1 %v476_v0  ;;  %409 = vmatpush3.bf16.msra.mxu0 %v443_v11  ;;  %v353_v39 = vld [vmem:[%s541_s2 + $0x2] ss:$0 sm:$0xff] }
  0x16   :  { %410 = vmatprep.subr.bf16.mxu0 %v476_v0 }
  0x18   :  { %393 = vmatpush3.bf16.msra.mxu1 %v437_v5 }
  0x19   :  { %394 = vmatprep.subr.bf16.mxu1 %v476_v0  ;;  %411 = vmatpush3.bf16.msra.mxu0 %v444_v12 }
  0x1a   :  { %412 = vmatprep.subr.bf16.mxu0 %v476_v0 }
  0x1c   :  { %395 = vmatpush3.bf16.msra.mxu1 %v438_v6 }
  0x1d   :  { %396 = vmatprep.subr.bf16.mxu1 %v476_v0  ;;  %413 = vmatpush3.bf16.msra.mxu0 %v445_v13 }
  0x1e   :  { %414 = vmatprep.subr.bf16.mxu0 %v476_v0 }
  0x20   :  { %397 = vmatpush3.bf16.msra.mxu1 %v439_v7 }
  0x21   :  { %398 = vmatprep.subr.bf16.mxu1 %v476_v0  ;;  %415 = vmatpush3.bf16.msra.mxu0 %v446_v14 }
  0x22   :  { %416 = vmatprep.subr.bf16.mxu0 %v476_v0 }
  0x24   :  { %399 = vmatpush3.bf16.msra.mxu1 %v440_v8 }
  0x25   :  { %400 = vmatprep.subr.bf16.mxu1 %v476_v0  ;;  %417 = vmatpush3.bf16.msra.mxu0 %v447_v15 }
  0x26   :  { %418 = vmatprep.subr.bf16.mxu0 %v476_v0 }
  0x28   :  { %401 = vmatpush3.bf16.msra.mxu1 %v441_v9 }
  0x29   :  { %402 = vmatprep.subr.bf16.mxu1 %v476_v0  ;;  %419 = vmatpush3.bf16.msra.mxu0 %v448_v26 }
  0x2a   :  { %420 = vmatprep.subr.bf16.mxu0 %v476_v0 }
  0x2c   :  { %403 = vmatpush3.bf16.msra.mxu1 %v442_v10 }
  0x2d   :  { %421 = vmatpush3.bf16.msra.mxu0 %v449_v27 }
  0x2e   :  { %422 = vmatprep.subr.bf16.mxu0 %v476_v0 }
  0x31   :  { %423 = vmatpush3.bf16.msra.mxu0 %v450_v28 }
  0xd3   :  { %v89_v17 = vpop.f32.mrf.mxu0 }
  0xd4   :  { %v90_v19 = vadd.f32 %v338_v16, %v89_v17 }
  0xd5   :  { %v386_v18 = vpop.f32.mrf.mxu0 }
  0xd6   :  { %v96_v23 = vmax.f32 %v90_v19, 0.0 }
  0xd7   :  { %v92_v20 = vpop.f32.mrf.mxu0 }
  0xd8   :  { %v93_v21 = vadd.f32 %v338_v16, %v92_v20 }
  0xd9   :  { %v387_v22 = vpop.f32.mrf.mxu0 }
  0xda   :  { %v97_v24 = vmax.f32 %v93_v21, 0.0 }
  0xdc   :  { %v98_v25 = vpack.c.bf16 %v97_v24, %v96_v23 }
  0xde   :  { %405 = vmatmul.mubr.bf16.vlgmr.msra.gmra.mxu1 %v98_v25 }
 0x19e   :  { %v206_v30 = vpop.f32.mrf.mxu1 }
 0x19f   :  { %v207_v32 = vadd.f32 %v343_v29, %v206_v30 }
 0x1a0   :  { %v406_v31 = vpop.f32.mrf.mxu1 }
 0x1a1   :  { %v213_v36 = vmax.f32 %v207_v32, 0.0 }
 0x1a2   :  { %v209_v33 = vpop.f32.mrf.mxu1 }
 0x1a3   :  { %v210_v34 = vadd.f32 %v343_v29, %v209_v33 }
 0x1a4   :  { %v407_v35 = vpop.f32.mrf.mxu1 }
 0x1a5   :  { %v214_v37 = vmax.f32 %v210_v34, 0.0 }
 0x1a7   :  { %v215_v38 = vpack.c.bf16 %v214_v37, %v213_v36 }
 0x1a9   :  { %425 = vmatmul.mubr.bf16.vlgmr.msra.gmra.mxu0 %v215_v38 }
 0x269   :  { %v323_v40 = vpop.f32.mrf.mxu0 }
 0x26a   :  { %v324_v41 = vadd.f32 %v353_v39, %v323_v40 }
 0x26b   :  { %v426_v42 = vpop.f32.mrf.mxu0 }
 0x26c   :  { %331 = vst.msk [vmem:[%s542_s3] sm:$0xff] %vm330_vm2, %v324_v41 }
 0x26d   :  { %v326_v43 = vpop.f32.mrf.mxu0 }
 0x26e   :  { %v327_v44 = vadd.f32 %v353_v39, %v326_v43 }
 0x26f   :  { %v427_v45 = vpop.f32.mrf.mxu0 }
 0x270   :  { %332 = vst.msk [vmem:[%s542_s3 + $0x8] sm:$0xff] %vm330_vm2, %v327_v44 }
 0x271   :  { %337 = vsyncpa [#allocation3], 1 }

</bundles_post_ra>
